<compile_context>
chip_gen: v5e
topology: v5e:2x2
jax: 0.10.0
libtpu: 0.0.40
codegen_flags: <defaults>
</compile_context>

<pallas_src>
import functools
import math

import jax
import jax.numpy as jnp
from jax.experimental import pallas as pl
from jax.experimental.pallas import tpu as pltpu


def _round_up(x, m):
    return ((x + m - 1) // m) * m


def _textcnn_kernel(x_ref, w_ref, b_ref, o_ref, xp_ref, *,
                    K, pad, L, L_out, TB, activation):
    """One grid step: TB batch rows, full sequence, direct K-tap conv.

    x_ref:  (TB, L, E)        fp32  raw input rows for this tile
    w_ref:  (K, E, Np)        bf16  conv weight, tap-major, resident
    b_ref:  (1, Np)           fp32  bias (lane-padded), resident
    o_ref:  (TB, L_out, Np)   fp32  lane-dense output tile
    xp_ref: (TB, L+2*pad, E)  bf16  VMEM scratch: zero-padded, bf16-cast input
    """
    # Zero-pad + cast to bf16 entirely in VMEM (no HBM-side padded/casted copy
    # of x).  Re-zeroed every step so the kernel stays correct when the
    # "parallel" grid axis is sharded across TensorCores (megacore).
    if pad > 0:
        xp_ref[...] = jnp.zeros_like(xp_ref)
    xp_ref[:, pad:pad + L, :] = x_ref[...].astype(jnp.bfloat16)

    bias = b_ref[...]                                   # (1, Np) fp32
    w_taps = [w_ref[k] for k in range(K)]               # K x (E, Np), hoisted

    for t in range(TB):                                 # static unroll
        acc = jnp.dot(xp_ref[t, 0:L_out, :], w_taps[0],
                      preferred_element_type=jnp.float32)
        for k in range(1, K):
            acc = acc + jnp.dot(xp_ref[t, k:k + L_out, :], w_taps[k],
                                preferred_element_type=jnp.float32)
        acc = acc + bias
        if activation == "Sigmoid":
            acc = jax.nn.sigmoid(acc)      # EUP
        elif activation == "Tanh":
            acc = jnp.tanh(acc)            # EUP
        else:                              # module default branch: ReLU
            acc = jnp.maximum(acc, 0.0)
        o_ref[t] = acc.astype(o_ref.dtype)


def textcnn_forward(x, weight, bias, kernel_size, activation="ReLU"):
    """Forward of TextCNN.

    x:      (B, L, E) float  (the module casts to float before the conv)
    weight: (F, E, K) PyTorch Conv1d weight layout
    bias:   (F,)
    Returns (B, L_out, F) float32 with L_out = L + 2*(K//2) - K + 1.
    """
    B, L, E = x.shape
    F_out = weight.shape[0]
    K = kernel_size
    pad = K // 2                       # math.floor(K / 2)
    L_out = L + 2 * pad - K + 1        # PyTorch Conv1d output length
    L_pad = L + 2 * pad
    Np = _round_up(F_out, 128)         # lane-dense output / weight N dim

    x = x.astype(jnp.float32)          # module's .float(); no-op for fp32 input
    # w_kef[k, e, f] = weight[f, e, k]; pad F -> Np (tiny, weight-only arrays)
    w_kef = jnp.pad(jnp.transpose(weight, (2, 1, 0)).astype(jnp.bfloat16),
                    ((0, 0), (0, 0), (0, Np - F_out)))
    b_p = jnp.pad(bias.astype(jnp.float32), (0, Np - F_out)).reshape(1, Np)

    # ---- tile selection: TB batch rows per grid step ------------------------
    try:
        vmem_phys = int(pltpu.get_tpu_info().vmem_capacity_bytes)
    except Exception:                  # off-TPU / older API: conservative v7x size
        vmem_phys = 64 * 2 ** 20
    vmem_limit = min(vmem_phys * 3 // 4, 64 * 2 ** 20)
    tile_budget = vmem_limit // 3      # headroom for pipeline internals

    def step_vmem_bytes(tb):
        return (2 * tb * L * E * 4             # fp32 x block, double-buffered
                + 2 * tb * L_out * Np * 4      # fp32 out block, double-buffered
                + tb * L_pad * E * 2           # bf16 padded scratch
                + 2 * K * E * Np * 2           # bf16 weight (double-buffered)
                + 2 * Np * 4)                  # bias

    target_rows = 512                  # ~85% of HBM roofline vs ~63% at 256
    tb_cap = min(max(1, target_rows // max(L_out, 1)), B, 128)
    while tb_cap > 1 and step_vmem_bytes(tb_cap) > tile_budget:
        tb_cap -= 1
    # Largest divisor of B <= tb_cap: avoids any batch-dim padding copy in HBM
    # and collapses small problems into a single grid step.
    TB = 1
    for d in range(1, tb_cap + 1):
        if B % d == 0:
            TB = d
    grid = (B // TB,)
    # TODO(synk): for very long sequences (a TB=1 block still over budget) an
    # extra L-axis grid dimension with a (K-1)-row halo DMA would be needed.

    n_out = B * L_out * Np
    if activation == "Sigmoid":
        transcendentals = 2 * n_out            # exp + reciprocal per element
    elif activation == "Tanh":
        transcendentals = n_out
    else:
        transcendentals = 0
    cost = pl.CostEstimate(
        flops=2 * B * L_out * K * E * Np,
        transcendentals=transcendentals,
        bytes_accessed=x.size * 4 + w_kef.size * 2 + b_p.size * 4 + n_out * 4,
    )

    kernel = functools.partial(_textcnn_kernel, K=K, pad=pad, L=L,
                               L_out=L_out, TB=TB, activation=activation)

    out = pl.pallas_call(
        kernel,
        out_shape=jax.ShapeDtypeStruct((B, L_out, Np), jnp.float32),
        grid_spec=pltpu.PrefetchScalarGridSpec(
            num_scalar_prefetch=0,
            grid=grid,
            in_specs=[
                # Raw input rows for this batch tile.  The last two block dims
                # equal the full array dims, so no (8,128) divisibility or
                # HBM-side padding is required.
                pl.BlockSpec((TB, L, E), lambda i: (i, 0, 0)),
                # Weight / bias: constant index map -> fetched once, resident.
                pl.BlockSpec((K, E, Np), lambda i: (0, 0, 0)),
                pl.BlockSpec((1, Np), lambda i: (0, 0)),
            ],
            out_specs=pl.BlockSpec((TB, L_out, Np), lambda i: (i, 0, 0)),
            scratch_shapes=[pltpu.VMEM((TB, L_pad, E), jnp.bfloat16)],
        ),
        compiler_params=pltpu.CompilerParams(
            dimension_semantics=("parallel",),
            vmem_limit_bytes=int(vmem_limit),
        ),
        cost_estimate=cost,
    )(x, w_kef, b_p)

    # Strip the lane padding only (kernel already emits (B, L_out, *)).
    return out[:, :, :F_out]


def _reference_forward(x, weight, bias, kernel_size, activation="ReLU"):
    """Pure-JAX fp32 reference matching the PyTorch TextCNN forward."""
    B, L, E = x.shape
    F_out = weight.shape[0]
    K = kernel_size
    pad = K // 2
    L_out = L + 2 * pad - K + 1
    x_pad = jnp.pad(x.astype(jnp.float32), ((0, 0), (pad, pad), (0, 0)))
    w_kef = jnp.transpose(weight, (2, 1, 0)).astype(jnp.float32)  # (K, E, F)
    out = jnp.zeros((B, L_out, F_out), jnp.float32)
    for k in range(K):
        out = out + jnp.einsum("ble,ef->blf", x_pad[:, k:k + L_out, :], w_kef[k])
    out = out + bias[None, None, :].astype(jnp.float32)
    if activation == "Sigmoid":
        return jax.nn.sigmoid(out)
    if activation == "Tanh":
        return jnp.tanh(out)
    return jnp.maximum(out, 0.0)


if __name__ == "__main__":
    # Config implied by the module __init__ (small, deterministic shapes).
    config = {
        "embedding_size": 32,      # E (Conv1d in_channels)
        "feature_size": 64,        # F (Conv1d out_channels)
        "kernel_size": 3,          # K
        "dropout_rate": 0.5,       # stored by the module but unused in forward
        "activation_function_type": "ReLU",
    }
    # TODO(synk): dropout_rate is stored by the module but never applied in
    # forward(), so it is intentionally not implemented.
    B, L = 2, 16
    E = config["embedding_size"]
    F_out = config["feature_size"]
    K = config["kernel_size"]

    key = jax.random.PRNGKey(0)
    kx, kw, kb = jax.random.split(key, 3)

    # Deterministic init mimicking PyTorch Conv1d default:
    # uniform(-bound, bound), bound = 1/sqrt(fan_in), fan_in = E * K.
    bound = 1.0 / math.sqrt(E * K)
    weight = jax.random.uniform(kw, (F_out, E, K), jnp.float32, -bound, bound)
    bias = jax.random.uniform(kb, (F_out,), jnp.float32, -bound, bound)
    x = jax.random.normal(kx, (B, L, E), jnp.float32)

    out = textcnn_forward(x, weight, bias, K,
                          activation=config["activation_function_type"])
    out = jax.block_until_ready(out)

    ref = _reference_forward(x, weight, bias, K,
                             activation=config["activation_function_type"])
    assert out.shape == (B, L, F_out), out.shape
    # bf16 MXU inputs with fp32 accumulation -> looser tolerance than pure fp32.
    assert jnp.allclose(out, ref, atol=2e-2, rtol=2e-2), "mismatch vs reference"

    print("KERNEL_OK")
</pallas_src>

<mosaic_0001>
module attributes {stable_mosaic.version = 11 : i64} {
  func.func @_textcnn_kernel(%arg0: i32, %arg1: memref<2x16x32xf32, #tpu.memory_space<vmem>>, %arg2: memref<3x32x128xbf16, #tpu.memory_space<vmem>>, %arg3: memref<1x128xf32, #tpu.memory_space<vmem>>, %arg4: memref<2x16x128xf32, #tpu.memory_space<vmem>>, %arg5: memref<2x18x32xbf16, #tpu.memory_space<vmem>>) attributes {dimension_semantics = [#tpu.dimension_semantics<parallel>], iteration_bounds = array<i64: 1>, scalar_prefetch = 0 : i64, scratch_operands = 1 : i64, tpu.core_type = #tpu.core_type<tc>, window_params = [{transform_indices = @transform_0, window_bounds = array<i64: 2, 16, 32>}, {pipeline_mode = #tpu.pipeline_mode<synchronous>, transform_indices = @transform_1, window_bounds = array<i64: 3, 32, 128>}, {pipeline_mode = #tpu.pipeline_mode<synchronous>, transform_indices = @transform_2, window_bounds = array<i64: 1, 128>}, {transform_indices = @transform_3, window_bounds = array<i64: 2, 16, 128>}]} {
    %cst = arith.constant 0.000000e+00 : bf16
    %0 = vector.broadcast %cst : bf16 to vector<2x18x32xbf16>
    %c0 = arith.constant 0 : index
    %c0_0 = arith.constant 0 : index
    %c0_1 = arith.constant 0 : index
    %1 = vector.load %arg5[%c0, %c0_0, %c0_1] : memref<2x18x32xbf16, #tpu.memory_space<vmem>>, vector<2x18x32xbf16>
    tpu.vector_store %arg5[%c0, %c0_0, %c0_1], %0 {strides = array<i32>} : memref<2x18x32xbf16, #tpu.memory_space<vmem>>, vector<2x18x32xbf16>,
    %c0_2 = arith.constant 0 : index
    %c0_3 = arith.constant 0 : index
    %c0_4 = arith.constant 0 : index
    %2 = vector.load %arg1[%c0_2, %c0_3, %c0_4] : memref<2x16x32xf32, #tpu.memory_space<vmem>>, vector<2x16x32xf32>
    %3 = arith.truncf %2 : vector<2x16x32xf32> to vector<2x16x32xbf16>
    %c0_5 = arith.constant 0 : index
    %c1 = arith.constant 1 : index
    %c0_6 = arith.constant 0 : index
    %4 = vector.load %arg5[%c0_5, %c1, %c0_6] : memref<2x18x32xbf16, #tpu.memory_space<vmem>>, vector<2x16x32xbf16>
    tpu.vector_store %arg5[%c0_5, %c1, %c0_6], %3 {strides = array<i32>} : memref<2x18x32xbf16, #tpu.memory_space<vmem>>, vector<2x16x32xbf16>,
    %c0_7 = arith.constant 0 : index
    %c0_8 = arith.constant 0 : index
    %5 = vector.load %arg3[%c0_7, %c0_8] : memref<1x128xf32, #tpu.memory_space<vmem>>, vector<1x128xf32>
    %c0_9 = arith.constant 0 : index
    %c0_10 = arith.constant 0 : index
    %c0_11 = arith.constant 0 : index
    %6 = vector.load %arg2[%c0_9, %c0_10, %c0_11] : memref<3x32x128xbf16, #tpu.memory_space<vmem>>, vector<1x32x128xbf16>
    %7 = vector.shape_cast %6 : vector<1x32x128xbf16> to vector<32x128xbf16>
    %c1_12 = arith.constant 1 : index
    %c0_13 = arith.constant 0 : index
    %c0_14 = arith.constant 0 : index
    %8 = vector.load %arg2[%c1_12, %c0_13, %c0_14] : memref<3x32x128xbf16, #tpu.memory_space<vmem>>, vector<1x32x128xbf16>
    %9 = vector.shape_cast %8 : vector<1x32x128xbf16> to vector<32x128xbf16>
    %c2 = arith.constant 2 : index
    %c0_15 = arith.constant 0 : index
    %c0_16 = arith.constant 0 : index
    %10 = vector.load %arg2[%c2, %c0_15, %c0_16] : memref<3x32x128xbf16, #tpu.memory_space<vmem>>, vector<1x32x128xbf16>
    %11 = vector.shape_cast %10 : vector<1x32x128xbf16> to vector<32x128xbf16>
    %c0_17 = arith.constant 0 : index
    %c0_18 = arith.constant 0 : index
    %c0_19 = arith.constant 0 : index
    %12 = vector.load %arg5[%c0_17, %c0_18, %c0_19] : memref<2x18x32xbf16, #tpu.memory_space<vmem>>, vector<1x16x32xbf16>
    %13 = vector.shape_cast %12 : vector<1x16x32xbf16> to vector<16x32xbf16>
    %cst_20 = arith.constant dense<0.000000e+00> : vector<16x128xf32>
    %14 = tpu.matmul %13, %7, %cst_20 {dimension_numbers = #tpu.dot_dimension_numbers<[1], [0], [0], [1], [0, 0, 1, 1], [], []>} : vector<16x32xbf16>, vector<32x128xbf16>, vector<16x128xf32> -> vector<16x128xf32>
    %c0_21 = arith.constant 0 : index
    %c1_22 = arith.constant 1 : index
    %c0_23 = arith.constant 0 : index
    %15 = vector.load %arg5[%c0_21, %c1_22, %c0_23] : memref<2x18x32xbf16, #tpu.memory_space<vmem>>, vector<1x16x32xbf16>
    %16 = vector.shape_cast %15 : vector<1x16x32xbf16> to vector<16x32xbf16>
    %cst_24 = arith.constant dense<0.000000e+00> : vector<16x128xf32>
    %17 = tpu.matmul %16, %9, %cst_24 {dimension_numbers = #tpu.dot_dimension_numbers<[1], [0], [0], [1], [0, 0, 1, 1], [], []>} : vector<16x32xbf16>, vector<32x128xbf16>, vector<16x128xf32> -> vector<16x128xf32>
    %18 = arith.addf %14, %17 : vector<16x128xf32>
    %c0_25 = arith.constant 0 : index
    %c2_26 = arith.constant 2 : index
    %c0_27 = arith.constant 0 : index
    %19 = vector.load %arg5[%c0_25, %c2_26, %c0_27] : memref<2x18x32xbf16, #tpu.memory_space<vmem>>, vector<1x16x32xbf16>
    %20 = vector.shape_cast %19 : vector<1x16x32xbf16> to vector<16x32xbf16>
    %cst_28 = arith.constant dense<0.000000e+00> : vector<16x128xf32>
    %21 = tpu.matmul %20, %11, %cst_28 {dimension_numbers = #tpu.dot_dimension_numbers<[1], [0], [0], [1], [0, 0, 1, 1], [], []>} : vector<16x32xbf16>, vector<32x128xbf16>, vector<16x128xf32> -> vector<16x128xf32>
    %22 = arith.addf %18, %21 : vector<16x128xf32>
    %23 = vector.broadcast %5 : vector<1x128xf32> to vector<16x128xf32>
    %24 = arith.addf %22, %23 : vector<16x128xf32>
    %cst_29 = arith.constant 0.000000e+00 : f32
    %25 = vector.broadcast %cst_29 : f32 to vector<16x128xf32>
    %26 = arith.maximumf %24, %25 : vector<16x128xf32>
    %c0_30 = arith.constant 0 : index
    %c0_31 = arith.constant 0 : index
    %c0_32 = arith.constant 0 : index
    %27 = vector.load %arg4[%c0_30, %c0_31, %c0_32] : memref<2x16x128xf32, #tpu.memory_space<vmem>>, vector<1x16x128xf32>
    %28 = vector.shape_cast %27 : vector<1x16x128xf32> to vector<16x128xf32>
    %29 = vector.shape_cast %26 : vector<16x128xf32> to vector<1x16x128xf32>
    tpu.vector_store %arg4[%c0_30, %c0_31, %c0_32], %29 {strides = array<i32>} : memref<2x16x128xf32, #tpu.memory_space<vmem>>, vector<1x16x128xf32>,
    %c1_33 = arith.constant 1 : index
    %c0_34 = arith.constant 0 : index
    %c0_35 = arith.constant 0 : index
    %30 = vector.load %arg5[%c1_33, %c0_34, %c0_35] : memref<2x18x32xbf16, #tpu.memory_space<vmem>>, vector<1x16x32xbf16>
    %31 = vector.shape_cast %30 : vector<1x16x32xbf16> to vector<16x32xbf16>
    %cst_36 = arith.constant dense<0.000000e+00> : vector<16x128xf32>
    %32 = tpu.matmul %31, %7, %cst_36 {dimension_numbers = #tpu.dot_dimension_numbers<[1], [0], [0], [1], [0, 0, 1, 1], [], []>} : vector<16x32xbf16>, vector<32x128xbf16>, vector<16x128xf32> -> vector<16x128xf32>
    %c1_37 = arith.constant 1 : index
    %c1_38 = arith.constant 1 : index
    %c0_39 = arith.constant 0 : index
    %33 = vector.load %arg5[%c1_37, %c1_38, %c0_39] : memref<2x18x32xbf16, #tpu.memory_space<vmem>>, vector<1x16x32xbf16>
    %34 = vector.shape_cast %33 : vector<1x16x32xbf16> to vector<16x32xbf16>
    %cst_40 = arith.constant dense<0.000000e+00> : vector<16x128xf32>
    %35 = tpu.matmul %34, %9, %cst_40 {dimension_numbers = #tpu.dot_dimension_numbers<[1], [0], [0], [1], [0, 0, 1, 1], [], []>} : vector<16x32xbf16>, vector<32x128xbf16>, vector<16x128xf32> -> vector<16x128xf32>
    %36 = arith.addf %32, %35 : vector<16x128xf32>
    %c1_41 = arith.constant 1 : index
    %c2_42 = arith.constant 2 : index
    %c0_43 = arith.constant 0 : index
    %37 = vector.load %arg5[%c1_41, %c2_42, %c0_43] : memref<2x18x32xbf16, #tpu.memory_space<vmem>>, vector<1x16x32xbf16>
    %38 = vector.shape_cast %37 : vector<1x16x32xbf16> to vector<16x32xbf16>
    %cst_44 = arith.constant dense<0.000000e+00> : vector<16x128xf32>
    %39 = tpu.matmul %38, %11, %cst_44 {dimension_numbers = #tpu.dot_dimension_numbers<[1], [0], [0], [1], [0, 0, 1, 1], [], []>} : vector<16x32xbf16>, vector<32x128xbf16>, vector<16x128xf32> -> vector<16x128xf32>
    %40 = arith.addf %36, %39 : vector<16x128xf32>
    %41 = vector.broadcast %5 : vector<1x128xf32> to vector<16x128xf32>
    %42 = arith.addf %40, %41 : vector<16x128xf32>
    %cst_45 = arith.constant 0.000000e+00 : f32
    %43 = vector.broadcast %cst_45 : f32 to vector<16x128xf32>
    %44 = arith.maximumf %42, %43 : vector<16x128xf32>
    %c1_46 = arith.constant 1 : index
    %c0_47 = arith.constant 0 : index
    %c0_48 = arith.constant 0 : index
    %45 = vector.load %arg4[%c1_46, %c0_47, %c0_48] : memref<2x16x128xf32, #tpu.memory_space<vmem>>, vector<1x16x128xf32>
    %46 = vector.shape_cast %45 : vector<1x16x128xf32> to vector<16x128xf32>
    %47 = vector.shape_cast %44 : vector<16x128xf32> to vector<1x16x128xf32>
    tpu.vector_store %arg4[%c1_46, %c0_47, %c0_48], %47 {strides = array<i32>} : memref<2x16x128xf32, #tpu.memory_space<vmem>>, vector<1x16x128xf32>,
    return
  }
  func.func @transform_0(%arg0: i32) -> (i32, i32, i32) {
    %c0_i32 = arith.constant 0 : i32
    %c0_i32_0 = arith.constant 0 : i32
    %c0_i32_1 = arith.constant 0 : i32
    return %arg0, %c0_i32, %c0_i32_0 : i32, i32, i32
  }
  func.func @transform_1(%arg0: i32) -> (i32, i32, i32) {
    %c0_i32 = arith.constant 0 : i32
    %c0_i32_0 = arith.constant 0 : i32
    %c0_i32_1 = arith.constant 0 : i32
    %c0_i32_2 = arith.constant 0 : i32
    return %c0_i32, %c0_i32_0, %c0_i32_1 : i32, i32, i32
  }
  func.func @transform_2(%arg0: i32) -> (i32, i32) {
    %c0_i32 = arith.constant 0 : i32
    %c0_i32_0 = arith.constant 0 : i32
    %c0_i32_1 = arith.constant 0 : i32
    return %c0_i32, %c0_i32_0 : i32, i32
  }
  func.func @transform_3(%arg0: i32) -> (i32, i32, i32) {
    %c0_i32 = arith.constant 0 : i32
    %c0_i32_0 = arith.constant 0 : i32
    %c0_i32_1 = arith.constant 0 : i32
    return %arg0, %c0_i32, %c0_i32_0 : i32, i32, i32
  }
}

</mosaic_0001>

<bundles_post_ra>
// kernel: tpu_custom_call.1
= control target key start
LH: loop header
LB: loop body
LE: loop exit
PB: predicated region body
PF: predicated region fallthrough
CT: control target
= control target key end

     0   :  { %8 = vsyncpa [#allocation4], 0  ;;  %s598_s0 = inlined_call_operand.hbm [shape: f32[2,16,32], index: 0, kind: input, shape index: {}]   ;;  %s599_s1 = inlined_call_operand.hbm [shape: bf16[3,32,128], index: 1, kind: input, shape index: {}]   ;;  %s600_s2 = inlined_call_operand.vmem [shape: f32[1,128], index: 2, kind: input, shape index: {}]   ;;  %s601_s3 = inlined_call_operand.hbm [shape: f32[2,16,128], index: 3, kind: output, shape index: {}]  }
   0x1   :  { %9 = vsyncpa [#allocation7], 0 }
   0x2   :  { %10 = vsyncpa [#allocation5], 0  ;;  %s15_s14 = sshll.u32 %s598_s0, 4  ;;  %s514_s15 = smov [#allocation3]   ;;  %s16_s14 = int_to_ptr.hbm [resolvable:$true] %s15_s14 }
   0x3   :  { %s17_s16 = sshll.u32 %s514_s15, 4  ;;  %s28_s19 = sshll.u32 %s599_s1, 4  ;;  %s18_s16 = int_to_ptr.vmem [resolvable:$true] %s17_s16  ;;  %s29_s19 = int_to_ptr.hbm [resolvable:$true] %s28_s19 }
   0x4   :  { %s515_s20 = smov 128   ;;  %s516_s21 = smov 8  }
   0x5   :  { %23 = dma.hbm_to_vmem [thread:$0]  %s16_s14, 512, %s18_s16, [#allocation4], %s515_s20, %s515_s20, %s516_s21  }
   0x6   :  { %s517_s22 = smov [#allocation6]   ;;  %s518_s24 = smov 64  }
   0x7   :  { %s30_s23 = sshll.u32 %s517_s22, 4  ;;  %s519_s0 = smov 4   ;;  %s31_s23 = int_to_ptr.vmem [resolvable:$true] %s30_s23 }
   0x8   :  { %36 = dma.hbm_to_vmem [thread:$0]  %s29_s19, 768, %s31_s23, [#allocation7], %s518_s24, %s518_s24, %s519_s0  }
   0x9   :  { %508 = dma.done.wait [#allocation4], 512  }
   0xa   :  { %509 = vsyncadd [#allocation4], 4294966784 }
   0xb   :  { %510 = dma.done.wait [#allocation7], 768  }
   0xc   :  { %511 = vsyncadd [#allocation7], 4294966528  ;;  %vm48_vm0 = vcmask 257024   ;;  %vm51_vm1 = vcmask 253952   ;;  %v520_v0 = vmov 0   ;;  %v412_v1 = vld [vmem:[#allocation6 + $0x8] sm:$0xff] }
   0xd   :  { %49 = vst.msk [vmem:[#allocation2] sm:$0xf] %vm48_vm0, %v520_v0  ;;  %v416_v2 = vld [vmem:[#allocation6 + $0x28] sm:$0xff]  ;;  %v414_v3 = vld [vmem:[#allocation6 + $0x18] sm:$0xff]  ;;  %v56_v4 = vld [vmem:[#allocation3] sm:$0xff]  ;;  %215 = vmatpush.bf16.msra.mxu1 %v412_v1  ;;  %vm177_vm8 = vcmask 261120  }
   0xe   :  { %50 = vst.msk [vmem:[#allocation2 + $0x4] sm:$0xf] %vm48_vm0, %v520_v0  ;;  %v57_v5 = vld [vmem:[#allocation3 + $0x8] sm:$0xff]  ;;  %v411_v6 = vld [vmem:[#allocation6] sm:$0xff]  ;;  %252 = vmatpush.bf16.msra.mxu2 %v416_v2  ;;  %v58_v7 = vld [vmem:[#allocation3 + $0x10] sm:$0xff]  ;;  %v60_v9 = vpack.c.bf16 %v56_v4, %v56_v4  ;;  %187 = vmatpush.bf16.msra.mxu0 %v414_v3  ;;  %vm227_vm9 = vcmask 1046528  }
   0xf   :  { %52 = vst.msk [vmem:[#allocation2 + $0x8] sm:$0x1] %vm51_vm1, %v520_v0  ;;  %v59_v8 = vld [vmem:[#allocation3 + $0x18] sm:$0xff]  ;;  %v61_v10 = vpack.c.bf16 %v57_v5, %v57_v5  ;;  %vm64_vm2 = vsmask.f32 256  ;;  %v62_v11 = vpack.c.bf16 %v58_v7, %v58_v7  ;;  %v415_v13 = vld [vmem:[#allocation6 + $0x20] sm:$0xff]  ;;  %304 = vmatpush.bf16.msra.mxu3 %v414_v3 }
  0x10   :  { %53 = vst.msk [vmem:[#allocation2 + $0xc] sm:$0xf] %vm48_vm0, %v520_v0  ;;  %v63_v12 = vpack.c.bf16 %v59_v8, %v59_v8  ;;  %vm65_vm3 = vsmask.f32 4368  ;;  %vm108_vm4 = vsmask.f32 7938  ;;  %vm115_vm7 = vmand %vm51_vm1, %vm64_vm2 }
  0x11   :  { %54 = vst.msk [vmem:[#allocation2 + $0x10] sm:$0xf] %vm48_vm0, %v520_v0  ;;  %v413_v14 = vld [vmem:[#allocation6 + $0x10] sm:$0xff]  ;;  %v68_v15 = vshrl.u32 %v60_v9, 16  ;;  %v71_v16 = vshll.u32 %v60_v9, 16  ;;  %v76_v17 = vshrl.u32 %v61_v10, 16  ;;  %216 = vmatpush.bf16.msra.mxu1 %v411_v6  ;;  %vm559_vm5 = vmor %vm64_vm2, %vm65_vm3 }
  0x12   :  { %55 = vst.msk [vmem:[#allocation2 + $0x14] sm:$0x1] %vm51_vm1, %v520_v0  ;;  %v79_v18 = vshll.u32 %v61_v10, 16  ;;  %v85_v19 = vshrl.u32 %v62_v11, 16  ;;  %v88_v20 = vshll.u32 %v62_v11, 16  ;;  %v93_v21 = vshrl.u32 %v63_v12, 16  ;;  %253 = vmatpush.bf16.msra.mxu2 %v415_v13  ;;  %188 = vmatpush.bf16.msra.mxu0 %v413_v14  ;;  %vm565_vm6 = vmand %vm48_vm0, %vm108_vm4 }
  0x13   :  { %v96_v22 = vshll.u32 %v63_v12, 16  ;;  %v70_v23 = vrot.slane %v68_v15, 7  ;;  %v78_v24 = vrot.slane %v76_v17, 7  ;;  %305 = vmatpush.bf16.msra.mxu3 %v413_v14  ;;  %vm152_vm10 = vsmask.f32 7424  ;;  %s367_s29 = sshll.u32 %s601_s3, 4  ;;  %s368_s29 = int_to_ptr.hbm [resolvable:$true] %s367_s29 }
  0x14   :  { %v87_v26 = vrot.slane %v85_v19, 7  ;;  %v95_v27 = vrot.slane %v93_v21, 7  ;;  %v110_v28 = vld [vmem:[#allocation2] sm:$0xf] }
  0x15   :  { %v73_v29 = vor.u32 %v71_v16, %v70_v23  ;;  %v74_v30 = vrot.slane %v70_v23, 4  ;;  %v81_v31 = vor.u32 %v79_v18, %v78_v24  ;;  %v83_v32 = vrot.slane %v78_v24, 4  ;;  %344 = vmatpush.bf16.msrb.mxu1 %v416_v2 }
  0x16   :  { %320 = vmatpush.bf16.msrb.mxu0 %v412_v1  ;;  %v90_v35 = vor.u32 %v88_v20, %v87_v26  ;;  %v91_v36 = vrot.slane %v87_v26, 4  ;;  %v98_v37 = vor.u32 %v96_v22, %v95_v27  ;;  %v100_v38 = vrot.slane %v95_v27, 4  ;;  %v116_v39 = vld [vmem:[#allocation2 + $0x8] sm:$0x1]  ;;  %v432_v20 = vld [vmem:[%s600_s2] ss:$0 sm:$0xff] }
  0x17   :  { %v119_v34 = vld [vmem:[#allocation2 + $0xc] sm:$0xf]  ;;  %v82_v40 = vsel %vm559_vm5, %v74_v30, %v81_v31  ;;  %v111_v41 = vsel %vm565_vm6, %v73_v29, %v110_v28  ;;  %v117_v45 = vsel %vm115_vm7, %v83_v32, %v116_v39  ;;  %s521_s2 = smov [#allocation8]  }
  0x18   :  { %v99_v43 = vsel %vm559_vm5, %v91_v36, %v98_v37  ;;  %112 = vst [vmem:[#allocation2] sm:$0xf] %v111_v41  ;;  %v120_v44 = vsel %vm565_vm6, %v90_v35, %v119_v34  ;;  %s365_s26 = sshll.u32 %s521_s2, 4  ;;  %s366_s26 = int_to_ptr.vmem [resolvable:$true] %s365_s26 }
  0x19   :  { %v123_v42 = vld [vmem:[#allocation2 + $0x14] sm:$0x1]  ;;  %113 = vst.msk [vmem:[#allocation2 + $0x4] sm:$0xf] %vm48_vm0, %v82_v40  ;;  %345 = vmatpush.bf16.msrb.mxu1 %v415_v13 }
  0x1a   :  { %321 = vmatpush.bf16.msrb.mxu0 %v411_v6  ;;  %121 = vst [vmem:[#allocation2 + $0xc] sm:$0xf] %v120_v44  ;;  %v124_v46 = vsel %vm115_vm7, %v100_v38, %v123_v42 }
  0x1b   :  { %122 = vst.msk [vmem:[#allocation2 + $0x10] sm:$0xf] %vm48_vm0, %v99_v43 }
  0x1c   :  { %118 = vst [vmem:[#allocation2 + $0x8] sm:$0x1] %v117_v45 }
  0x1d   :  { %125 = vst [vmem:[#allocation2 + $0x14] sm:$0x1] %v124_v46 }
  0x1f   :  { %v422_v47 = vld [vmem:[#allocation2] sm:$0xe] }
  0x20   :  { %v418_v48 = vld [vmem:[#allocation2] sm:$0xff]  }
  0x21   :  { %v421_v49 = vld [vmem:[#allocation2] sm:$0xf0]  ;;  %v156_v50 = vshll.u32 %v418_v48, 16  ;;  %398 = vmatmul.msk.bf16.vlgmr.msra.gmra.mxu1 %vm177_vm8, %v418_v48  ;;  %v434_v51 = vld [vmem:[#allocation2 + $0xc] sm:$0xe]  ;;  %v154_v56 = vshrl.u32 %v418_v48, 16 }
  0x22   :  { %v423_v52 = vor.u32 %v422_v47, %v421_v49  ;;  %v272_v53 = vld [vmem:[#allocation2 + $0xc] sm:$0xff]  }
  0x23   :  { %v433_v54 = vld [vmem:[#allocation2 + $0xc] sm:$0xf0]  ;;  %v143_v55 = vld [vmem:[#allocation2 + $0x8] sm:$0x1]  ;;  %v158_v57 = vrot.slane %v156_v50, 1  ;;  %v284_v1 = vshrl.u32 %v272_v53, 16 }
  0x24   :  { %v149_v58 = vunpack.c.l.b16 %v143_v55  ;;  %v274_v59 = vld [vmem:[#allocation2 + $0x14] sm:$0x1]  ;;  %v228_v62 = vrot.slane %v423_v52, 1  ;;  %v435_v63 = vor.u32 %v434_v51, %v433_v54  ;;  %v286_v2 = vshll.u32 %v272_v53, 16 }
  0x25   :  { %v280_v60 = vunpack.c.l.b16 %v274_v59  ;;  %v159_v3 = vor.u32 %v158_v57, %v154_v56 }
  0x26   :  { %v151_v61 = vpack.c.b16 %v149_v58, %v149_v58  ;;  %v288_v6 = vrot.slane %v286_v2, 1  ;;  %v332_v10 = vrot.slane %v435_v63, 1 }
  0x27   :  { %v282_v0 = vpack.c.b16 %v280_v60, %v280_v60 }
  0x28   :  { %v229_v4 = vrot.slane %v151_v61, 1  ;;  %v161_v5 = vshll.u32 %v151_v61, 16  ;;  %v289_v12 = vor.u32 %v288_v6, %v284_v1 }
  0x29   :  { %v291_v7 = vshll.u32 %v282_v0, 16  ;;  %v333_v11 = vrot.slane %v282_v0, 1 }
  0x2a   :  { %v230_v8 = vsel %vm227_vm9, %v228_v62, %v229_v4  ;;  %v163_v9 = vrot.slane %v161_v5, 1 }
  0x2b   :  { %407 = vmatmul.msk.bf16.vlgmr.msra.gmra.mxu2 %vm177_vm8, %v230_v8  ;;  %v293_v13 = vrot.slane %v291_v7, 1  ;;  %v334_v16 = vsel %vm227_vm9, %v332_v10, %v333_v11 }
  0x2c   :  { %v164_v14 = vsel %vm152_vm10, %v159_v3, %v163_v9 }
  0x2d   :  { %389 = vmatmul.msk.bf16.vlgmr.msra.gmra.mxu0 %vm177_vm8, %v164_v14  ;;  %v294_v15 = vsel %vm152_vm10, %v289_v12, %v293_v13 }
  0x2e   :  { %408 = vmatmul.msk.bf16.vlgmr.msra.gmra.mxu3 %vm177_vm8, %v294_v15 }
  0x31   :  { %410 = vmatmul.msk.bf16.vlgmr.msrb.gmra.mxu1 %vm177_vm8, %v334_v16 }
  0x3d   :  { %409 = vmatmul.msk.bf16.vlgmr.msrb.gmra.mxu0 %vm177_vm8, %v272_v53 }
  0x9e   :  { %v218_v17 = vpop.f32.mrf.mxu1 }
  0xa6   :  { %v220_v23 = vpop.f32.mrf.mxu1 }
  0xaa   :  { %v190_v18 = vpop.f32.mrf.mxu0 }
  0xab   :  { %v219_v19 = vadd.f32 %v218_v17, %v190_v18 }
  0xae   :  { %v255_v21 = vpop.f32.mrf.mxu2  ;;  %v347_v32 = vpop.f32.mrf.mxu1 }
  0xaf   :  { %v260_v22 = vadd.f32 %v255_v21, %v219_v19 }
  0xb1   :  { %v265_v24 = vadd.f32 %v432_v20, %v260_v22  ;;  %v307_v30 = vpop.f32.mrf.mxu3 }
  0xb2   :  { %v192_v25 = vpop.f32.mrf.mxu0 }
  0xb3   :  { %v267_v26 = vmax.f32 %v265_v24, 0.0  ;;  %v221_v27 = vadd.f32 %v220_v23, %v192_v25 }
  0xb5   :  { %269 = vst [vmem:[#allocation8] sm:$0xff] %v267_v26 }
  0xb6   :  { %v257_v28 = vpop.f32.mrf.mxu2  ;;  %v349_v42 = vpop.f32.mrf.mxu1 }
  0xb7   :  { %v261_v29 = vadd.f32 %v257_v28, %v221_v27 }
  0xb9   :  { %v266_v31 = vadd.f32 %v432_v20, %v261_v29  ;;  %v309_v39 = vpop.f32.mrf.mxu3 }
  0xba   :  { %v323_v33 = vpop.f32.mrf.mxu0 }
  0xbb   :  { %v268_v34 = vmax.f32 %v266_v31, 0.0  ;;  %v324_v35 = vadd.f32 %v323_v33, %v307_v30 }
  0xbd   :  { %270 = vst [vmem:[#allocation8 + $0x8] sm:$0xff] %v268_v34  ;;  %v352_v36 = vadd.f32 %v347_v32, %v324_v35 }
  0xbf   :  { %v354_v37 = vadd.f32 %v432_v20, %v352_v36 }
  0xc1   :  { %v356_v38 = vmax.f32 %v354_v37, 0.0 }
  0xc2   :  { %v325_v40 = vpop.f32.mrf.mxu0 }
  0xc3   :  { %359 = vst [vmem:[#allocation8 + $0x10] sm:$0xff] %v356_v38  ;;  %v326_v41 = vadd.f32 %v325_v40, %v309_v39 }
  0xc5   :  { %v353_v43 = vadd.f32 %v349_v42, %v326_v41 }
  0xc7   :  { %v355_v44 = vadd.f32 %v432_v20, %v353_v43 }
  0xc9   :  { %v357_v45 = vmax.f32 %v355_v44, 0.0 }
  0xcb   :  { %360 = vst [vmem:[#allocation8 + $0x18] sm:$0xff] %v357_v45 }
  0xcc   :  { %373 = dma.vmem_to_hbm [thread:$0]  %s366_s26, 512, %s368_s29, [#allocation5], %s515_s20, %s515_s20, %s516_s21  }
  0xcd   :  { %512 = dma.done.wait [#allocation5], 512  }
  0xce   :  { %513 = vsyncadd [#allocation5], 4294966784 }
  0xcf   :  { %378 = vsyncpa [#allocation4], 1 }
  0xd0   :  { %379 = vsyncpa [#allocation7], 1 }
  0xd1   :  { %380 = vsyncpa [#allocation5], 1 }

</bundles_post_ra>
